<compile_context>
chip_gen: v7x
topology: tpu7x:2x2x1
jax: 0.10.0
libtpu: 0.0.40
codegen_flags: <defaults>
</compile_context>

<pallas_src>
import jax
import jax.numpy as jnp
from jax.experimental import pallas as pl
from jax.experimental.pallas import tpu as pltpu


def mlp_kernel(x_ref, w1_ref, b1_ref, w2_ref, b2_ref, w3_ref, b3_ref, o_ref):
    # In-kernel cast of the streamed f32 tile to bf16 for the MXU.
    x = x_ref[...].astype(jnp.bfloat16)
    # Layer 1: (TB,400)bf16 @ (400,200)bf16 -> f32, +bias, ReLU
    h1 = jnp.dot(x, w1_ref[...], preferred_element_type=jnp.float32)
    h1 = jnp.maximum(h1 + b1_ref[...], 0.0).astype(jnp.bfloat16)
    # Layer 2: (TB,200)bf16 @ (200,100)bf16 -> f32, +bias, ReLU
    h2 = jnp.dot(h1, w2_ref[...], preferred_element_type=jnp.float32)
    h2 = jnp.maximum(h2 + b2_ref[...], 0.0).astype(jnp.bfloat16)
    # Layer 3: (TB,100)bf16 @ (100,10)bf16 -> f32, +bias
    out = jnp.dot(h2, w3_ref[...], preferred_element_type=jnp.float32) + b3_ref[...]
    o_ref[...] = out.astype(o_ref.dtype)


def le_classifier(x, w1, b1, w2, b2, w3, b3, *, tb=2048):
    """x: (B, 400) f32. Returns (B, 10) f32 logits."""
    B, F_in = x.shape
    N_out = w3.shape[1]  # 10

    # Adaptive batch tile: multiple of 8 (sublane), capped at `tb`.
    tb = min(tb, max(8, pl.cdiv(B, 8) * 8))
    # v7x megacore: prefer >= 2 grid steps when the batch is large enough to split.
    if B >= 16 and pl.cdiv(B, tb) < 2:
        tb = max(8, pl.cdiv(pl.cdiv(B, 2), 8) * 8)
    grid = (pl.cdiv(B, tb),)

    # bf16 weights for the MXU; f32 biases (added to the f32 accumulator).
    w1b = w1.astype(jnp.bfloat16)
    w2b = w2.astype(jnp.bfloat16)
    w3b = w3.astype(jnp.bfloat16)
    b1f = b1.astype(jnp.float32)
    b2f = b2.astype(jnp.float32)
    b3f = b3.astype(jnp.float32)

    # Weights/biases: full-array blocks with constant index_map -> VMEM-resident,
    # DMA'd once across the whole batch grid.
    const = lambda a: pl.BlockSpec(a.shape, lambda i: (0,) * a.ndim)

    flops = 2 * B * (400 * 200 + 200 * 100 + 100 * 10)
    bytes_accessed = (B * (F_in * 4 + N_out * 4)
                      + (400 * 200 + 200 * 100 + 100 * 10) * 2
                      + (200 + 100 + 10) * 4)

    return pl.pallas_call(
        mlp_kernel,
        out_shape=jax.ShapeDtypeStruct((B, N_out), jnp.float32),
        grid=grid,
        in_specs=[
            pl.BlockSpec((tb, F_in), lambda i: (i, 0)),  # x: streamed over batch
            const(w1b), const(b1f),
            const(w2b), const(b2f),
            const(w3b), const(b3f),
        ],
        out_specs=pl.BlockSpec((tb, N_out), lambda i: (i, 0)),
        compiler_params=pltpu.CompilerParams(
            dimension_semantics=("parallel",)),
        cost_estimate=pl.CostEstimate(
            flops=flops, transcendentals=0, bytes_accessed=bytes_accessed),
    )(x, w1b, b1f, w2b, b2f, w3b, b3f)


def init_params(key):
    # Deterministic init mimicking PyTorch nn.Linear default:
    # U(-1/sqrt(fan_in), 1/sqrt(fan_in)) for both weights and biases.
    # Weights stored as (in_features, out_features) so the kernel computes x @ W + b.
    def linear(key, fan_in, fan_out):
        kw, kb = jax.random.split(key)
        bound = 1.0 / jnp.sqrt(fan_in)
        w = jax.random.uniform(kw, (fan_in, fan_out), jnp.float32, -bound, bound)
        b = jax.random.uniform(kb, (1, fan_out), jnp.float32, -bound, bound)
        return w, b

    k1, k2, k3 = jax.random.split(key, 3)
    w1, b1 = linear(k1, 400, 200)
    w2, b2 = linear(k2, 200, 100)
    w3, b3 = linear(k3, 100, 10)
    return w1, b1, w2, b2, w3, b3


def reference_f32(x, w1, b1, w2, b2, w3, b3):
    h1 = jnp.maximum(x @ w1 + b1, 0.0)
    h2 = jnp.maximum(h1 @ w2 + b2, 0.0)
    return h2 @ w3 + b3


def reference_bf16(x, w1, b1, w2, b2, w3, b3):
    # Mirrors the kernel's mixed-precision math (bf16 MXU inputs, f32 accumulate).
    xb = x.astype(jnp.bfloat16)
    h1 = jnp.dot(xb, w1.astype(jnp.bfloat16), preferred_element_type=jnp.float32)
    h1 = jnp.maximum(h1 + b1, 0.0).astype(jnp.bfloat16)
    h2 = jnp.dot(h1, w2.astype(jnp.bfloat16), preferred_element_type=jnp.float32)
    h2 = jnp.maximum(h2 + b2, 0.0).astype(jnp.bfloat16)
    return jnp.dot(h2, w3.astype(jnp.bfloat16),
                   preferred_element_type=jnp.float32) + b3


if __name__ == "__main__":
    key = jax.random.PRNGKey(0)
    kx, kx2, kp = jax.random.split(key, 3)
    params = init_params(kp)

    # Small, sublane-aligned check (single grid step).
    B = 8
    x = jax.random.normal(kx, (B, 400), jnp.float32)
    out = jax.block_until_ready(le_classifier(x, *params))
    assert out.shape == (B, 10), out.shape
    assert jnp.allclose(out, reference_bf16(x, *params), atol=1e-3, rtol=1e-3), \
        "mismatch vs bf16-mirrored reference"
    assert jnp.allclose(out, reference_f32(x, *params), atol=3e-2, rtol=3e-2), \
        "mismatch vs f32 reference"

    # Multi-tile, ragged-batch check: exercises the >=2-step grid, resident
    # weights, and the masked (non-divisible) last block.
    B2 = 20
    x2 = jax.random.normal(kx2, (B2, 400), jnp.float32)
    out2 = jax.block_until_ready(le_classifier(x2, *params, tb=16))
    assert out2.shape == (B2, 10), out2.shape
    assert jnp.allclose(out2, reference_bf16(x2, *params), atol=1e-3, rtol=1e-3), \
        "mismatch vs bf16-mirrored reference (multi-tile)"
    assert jnp.allclose(out2, reference_f32(x2, *params), atol=3e-2, rtol=3e-2), \
        "mismatch vs f32 reference (multi-tile)"

    print("KERNEL_OK")
</pallas_src>

<mosaic_0001>
module attributes {stable_mosaic.version = 11 : i64} {
  func.func @mlp_kernel(%arg0: i32, %arg1: memref<8x400xf32, #tpu.memory_space<vmem>>, %arg2: memref<400x200xbf16, #tpu.memory_space<vmem>>, %arg3: memref<1x200xf32, #tpu.memory_space<vmem>>, %arg4: memref<200x100xbf16, #tpu.memory_space<vmem>>, %arg5: memref<1x100xf32, #tpu.memory_space<vmem>>, %arg6: memref<100x10xbf16, #tpu.memory_space<vmem>>, %arg7: memref<1x10xf32, #tpu.memory_space<vmem>>, %arg8: memref<8x10xf32, #tpu.memory_space<vmem>>) attributes {dimension_semantics = [#tpu.dimension_semantics<parallel>], iteration_bounds = array<i64: 1>, scalar_prefetch = 0 : i64, scratch_operands = 0 : i64, tpu.core_type = #tpu.core_type<tc>, window_params = [{transform_indices = @transform_0, window_bounds = array<i64: 8, 400>}, {pipeline_mode = #tpu.pipeline_mode<synchronous>, transform_indices = @transform_1, window_bounds = array<i64: 400, 200>}, {pipeline_mode = #tpu.pipeline_mode<synchronous>, transform_indices = @transform_2, window_bounds = array<i64: 1, 200>}, {pipeline_mode = #tpu.pipeline_mode<synchronous>, transform_indices = @transform_3, window_bounds = array<i64: 200, 100>}, {pipeline_mode = #tpu.pipeline_mode<synchronous>, transform_indices = @transform_4, window_bounds = array<i64: 1, 100>}, {pipeline_mode = #tpu.pipeline_mode<synchronous>, transform_indices = @transform_5, window_bounds = array<i64: 100, 10>}, {pipeline_mode = #tpu.pipeline_mode<synchronous>, transform_indices = @transform_6, window_bounds = array<i64: 1, 10>}, {transform_indices = @transform_7, window_bounds = array<i64: 8, 10>}]} {
    %c0 = arith.constant 0 : index
    %c0_0 = arith.constant 0 : index
    %0 = vector.load %arg1[%c0, %c0_0] : memref<8x400xf32, #tpu.memory_space<vmem>>, vector<8x400xf32>
    %1 = arith.truncf %0 : vector<8x400xf32> to vector<8x400xbf16>
    %c0_1 = arith.constant 0 : index
    %c0_2 = arith.constant 0 : index
    %2 = vector.load %arg2[%c0_1, %c0_2] : memref<400x200xbf16, #tpu.memory_space<vmem>>, vector<400x200xbf16>
    %cst = arith.constant dense<0.000000e+00> : vector<8x200xf32>
    %3 = tpu.matmul %1, %2, %cst {dimension_numbers = #tpu.dot_dimension_numbers<[1], [0], [0], [1], [0, 0, 1, 1], [], []>} : vector<8x400xbf16>, vector<400x200xbf16>, vector<8x200xf32> -> vector<8x200xf32>
    %c0_3 = arith.constant 0 : index
    %c0_4 = arith.constant 0 : index
    %4 = vector.load %arg3[%c0_3, %c0_4] : memref<1x200xf32, #tpu.memory_space<vmem>>, vector<1x200xf32>
    %5 = vector.broadcast %4 : vector<1x200xf32> to vector<8x200xf32>
    %6 = arith.addf %3, %5 : vector<8x200xf32>
    %cst_5 = arith.constant 0.000000e+00 : f32
    %7 = vector.broadcast %cst_5 : f32 to vector<8x200xf32>
    %8 = arith.maximumf %6, %7 : vector<8x200xf32>
    %9 = arith.truncf %8 : vector<8x200xf32> to vector<8x200xbf16>
    %c0_6 = arith.constant 0 : index
    %c0_7 = arith.constant 0 : index
    %10 = vector.load %arg4[%c0_6, %c0_7] : memref<200x100xbf16, #tpu.memory_space<vmem>>, vector<200x100xbf16>
    %cst_8 = arith.constant dense<0.000000e+00> : vector<8x100xf32>
    %11 = tpu.matmul %9, %10, %cst_8 {dimension_numbers = #tpu.dot_dimension_numbers<[1], [0], [0], [1], [0, 0, 1, 1], [], []>} : vector<8x200xbf16>, vector<200x100xbf16>, vector<8x100xf32> -> vector<8x100xf32>
    %c0_9 = arith.constant 0 : index
    %c0_10 = arith.constant 0 : index
    %12 = vector.load %arg5[%c0_9, %c0_10] : memref<1x100xf32, #tpu.memory_space<vmem>>, vector<1x100xf32>
    %13 = vector.broadcast %12 : vector<1x100xf32> to vector<8x100xf32>
    %14 = arith.addf %11, %13 : vector<8x100xf32>
    %cst_11 = arith.constant 0.000000e+00 : f32
    %15 = vector.broadcast %cst_11 : f32 to vector<8x100xf32>
    %16 = arith.maximumf %14, %15 : vector<8x100xf32>
    %17 = arith.truncf %16 : vector<8x100xf32> to vector<8x100xbf16>
    %c0_12 = arith.constant 0 : index
    %c0_13 = arith.constant 0 : index
    %18 = vector.load %arg6[%c0_12, %c0_13] : memref<100x10xbf16, #tpu.memory_space<vmem>>, vector<100x10xbf16>
    %cst_14 = arith.constant dense<0.000000e+00> : vector<8x10xf32>
    %19 = tpu.matmul %17, %18, %cst_14 {dimension_numbers = #tpu.dot_dimension_numbers<[1], [0], [0], [1], [0, 0, 1, 1], [], []>} : vector<8x100xbf16>, vector<100x10xbf16>, vector<8x10xf32> -> vector<8x10xf32>
    %c0_15 = arith.constant 0 : index
    %c0_16 = arith.constant 0 : index
    %20 = vector.load %arg7[%c0_15, %c0_16] : memref<1x10xf32, #tpu.memory_space<vmem>>, vector<1x10xf32>
    %21 = vector.broadcast %20 : vector<1x10xf32> to vector<8x10xf32>
    %22 = arith.addf %19, %21 : vector<8x10xf32>
    %c0_17 = arith.constant 0 : index
    %c0_18 = arith.constant 0 : index
    %23 = vector.load %arg8[%c0_17, %c0_18] : memref<8x10xf32, #tpu.memory_space<vmem>>, vector<8x10xf32>
    tpu.vector_store %arg8[%c0_17, %c0_18], %22 {strides = array<i32>} : memref<8x10xf32, #tpu.memory_space<vmem>>, vector<8x10xf32>,
    return
  }
  func.func @transform_0(%arg0: i32) -> (i32, i32) {
    %c0_i32 = arith.constant 0 : i32
    %c0_i32_0 = arith.constant 0 : i32
    return %arg0, %c0_i32 : i32, i32
  }
  func.func @transform_1(%arg0: i32) -> (i32, i32) {
    %c0_i32 = arith.constant 0 : i32
    %c0_i32_0 = arith.constant 0 : i32
    %c0_i32_1 = arith.constant 0 : i32
    return %c0_i32, %c0_i32_0 : i32, i32
  }
  func.func @transform_2(%arg0: i32) -> (i32, i32) {
    %c0_i32 = arith.constant 0 : i32
    %c0_i32_0 = arith.constant 0 : i32
    %c0_i32_1 = arith.constant 0 : i32
    return %c0_i32, %c0_i32_0 : i32, i32
  }
  func.func @transform_3(%arg0: i32) -> (i32, i32) {
    %c0_i32 = arith.constant 0 : i32
    %c0_i32_0 = arith.constant 0 : i32
    %c0_i32_1 = arith.constant 0 : i32
    return %c0_i32, %c0_i32_0 : i32, i32
  }
  func.func @transform_4(%arg0: i32) -> (i32, i32) {
    %c0_i32 = arith.constant 0 : i32
    %c0_i32_0 = arith.constant 0 : i32
    %c0_i32_1 = arith.constant 0 : i32
    return %c0_i32, %c0_i32_0 : i32, i32
  }
  func.func @transform_5(%arg0: i32) -> (i32, i32) {
    %c0_i32 = arith.constant 0 : i32
    %c0_i32_0 = arith.constant 0 : i32
    %c0_i32_1 = arith.constant 0 : i32
    return %c0_i32, %c0_i32_0 : i32, i32
  }
  func.func @transform_6(%arg0: i32) -> (i32, i32) {
    %c0_i32 = arith.constant 0 : i32
    %c0_i32_0 = arith.constant 0 : i32
    %c0_i32_1 = arith.constant 0 : i32
    return %c0_i32, %c0_i32_0 : i32, i32
  }
  func.func @transform_7(%arg0: i32) -> (i32, i32) {
    %c0_i32 = arith.constant 0 : i32
    %c0_i32_0 = arith.constant 0 : i32
    return %arg0, %c0_i32 : i32, i32
  }
}

</mosaic_0001>

<bundles_post_ra>
// kernel: tpu_custom_call.1
= control target key start
LH: loop header
LB: loop body
LE: loop exit
PB: predicated region body
PF: predicated region fallthrough
CT: control target
= control target key end

     0   :  { %12 = vsyncpa [#allocation3], 0  ;;  %s1173_s0 = inlined_call_operand.vmem [shape: f32[8,400], index: 0, kind: input, shape index: {}]   ;;  %s1174_s1 = inlined_call_operand.hbm [shape: bf16[400,200], index: 1, kind: input, shape index: {}]   ;;  %s1175_s2 = inlined_call_operand.vmem [shape: f32[1,200], index: 2, kind: input, shape index: {}]   ;;  %s1176_s3 = inlined_call_operand.hbm [shape: bf16[200,100], index: 3, kind: input, shape index: {}]   ;;  %s1177_s4 = inlined_call_operand.vmem [shape: f32[1,100], index: 4, kind: input, shape index: {}]   ;;  %s1178_s5 = inlined_call_operand.vmem [shape: bf16[100,10], index: 5, kind: input, shape index: {}]   ;;  %s1179_s6 = inlined_call_operand.vmem [shape: f32[1,10], index: 6, kind: input, shape index: {}]   ;;  %s1180_s7 = inlined_call_operand.hbm [shape: f32[8,10], index: 7, kind: output, shape index: {}]  }
   0x1   :  { %13 = vsyncpa [#allocation6], 0 }
   0x2   :  { %14 = vsyncpa [#allocation4], 0  ;;  %s1032_s24 = smov [#allocation2]   ;;  %s960_s28 = scalar_lea.hbm %s1174_s1, 6400 }
   0x3   :  { %s22_s25 = sshll.u32 %s1032_s24, 4  ;;  %p961_p0 = scmp.ne.s32.totalorder %s1174_s1, %s960_s28  ;;  %s23_s25 = int_to_ptr.vmem [resolvable:$true] %s22_s25 }
   0x4   :  { %p964_p1 = scmp.lt.u32.totalorder %s960_s28, %s1174_s1 }
   0x6   :  { %p966_p2 = pnand %p964_p1, %p961_p0 }
   0x8   :  { %969 = shalt.err (!%p966_p2)
}
   0x9   :  { %s970_s10 = scalar_lea.vmem %s23_s25, 6400  ;;  %p975_p4 = scmp.lt.s32.totalorder %s23_s25, %s23_s25 }
   0xa   :  { %p971_p3 = scmp.ne.s32.totalorder %s23_s25, %s970_s10  ;;  %p976_p5 = scmp.lt.s32.totalorder %s970_s10, %s970_s10 }
   0xc   :  { %p977_p6 = por %p976_p5, %p975_p4 }
   0xe   :  { %p978_p7 = pnand %p977_p6, %p971_p3 }
  0x10   :  { %981 = shalt.err (!%p978_p7)
}
  0x11   :  { %s1033_s11 = smov 128   ;;  %s1034_s12 = smov 8  }
  0x12   :  { %28 = dma.hbm_to_vmem [thread:$0]  %s1174_s1, 6400, %s23_s25, [#allocation3], %s1033_s11, %s1033_s11, %s1034_s12  }
  0x13   :  { %s1035_s15 = smov [#allocation5]   ;;  %s982_s19 = scalar_lea.hbm %s1176_s3, 1600 }
  0x14   :  { %s36_s16 = sshll.u32 %s1035_s15, 4  ;;  %p983_p8 = scmp.ne.s32.totalorder %s1176_s3, %s982_s19  ;;  %s37_s16 = int_to_ptr.vmem [resolvable:$true] %s36_s16 }
  0x15   :  { %p986_p9 = scmp.lt.u32.totalorder %s982_s19, %s1176_s3 }
  0x17   :  { %p988_p10 = pnand %p986_p9, %p983_p8 }
  0x19   :  { %991 = shalt.err (!%p988_p10)
}
  0x1a   :  { %s992_s24 = scalar_lea.vmem %s37_s16, 1600  ;;  %p997_p12 = scmp.lt.s32.totalorder %s37_s16, %s37_s16 }
  0x1b   :  { %p993_p11 = scmp.ne.s32.totalorder %s37_s16, %s992_s24  ;;  %p998_p13 = scmp.lt.s32.totalorder %s992_s24, %s992_s24 }
  0x1d   :  { %p999_p0 = por %p998_p13, %p997_p12 }
  0x1f   :  { %p1000_p1 = pnand %p999_p0, %p993_p11 }
  0x21   :  { %1003 = shalt.err (!%p1000_p1)
}
  0x22   :  { %s1036_s1 = smov 64   ;;  %s1037_s25 = smov 4  }
  0x23   :  { %42 = dma.hbm_to_vmem [thread:$0]  %s1176_s3, 1600, %s37_s16, [#allocation6], %s1036_s1, %s1036_s1, %s1037_s25  }
  0x24   :  { %1026 = dma.done.wait [#allocation3], 6400  }
  0x25   :  { %1027 = vsyncadd [#allocation3], 4294960896 }
  0x26   :  { %1028 = dma.done.wait [#allocation6], 1600  }
  0x27   :  { %1029 = vsyncadd [#allocation6], 4294965696  ;;  %v1038_v0 = vmov 0   ;;  %v865_v1 = vld [vmem:[#allocation2 + $0x4] ss:$8 sps:$4 sm:$0xff]   ;;  %v940_v23 = vld [vmem:[#allocation5] sm:$0xff]  }
  0x28   :  { %581 = vmatprep.subr.bf16.mxu1 %v1038_v0  ;;  %v867_v2 = vld [vmem:[#allocation2] ss:$8 sps:$4 sm:$0xff]   ;;  %380 = vmatprep.subr.bf16.mxu0 %v865_v1  ;;  %v868_v3 = vld [vmem:[#allocation2 + $0x14] ss:$8 sps:$4 sm:$0xff]   ;;  %v870_v4 = vld [vmem:[#allocation2 + $0x10] ss:$8 sps:$4 sm:$0xff]  }
  0x29   :  { %381 = vmatpush1.bf16.msra.mxu0 %v867_v2  ;;  %v871_v5 = vld [vmem:[#allocation2 + $0x24] ss:$8 sps:$4 sm:$0xff]   ;;  %v873_v6 = vld [vmem:[#allocation2 + $0x20] ss:$8 sps:$4 sm:$0xff]   ;;  %v874_v7 = vld [vmem:[#allocation2 + $0x34] ss:$8 sps:$4 sm:$0xff]   ;;  %582 = vmatpush1.bf16.msra.mxu1 %v940_v23 }
  0x2a   :  { %382 = vmatprep.subr.bf16.mxu0 %v868_v3  ;;  %v876_v8 = vld [vmem:[#allocation2 + $0x30] ss:$8 sps:$4 sm:$0xff]   ;;  %v877_v9 = vld [vmem:[#allocation2 + $0x44] ss:$8 sps:$4 sm:$0xff]   ;;  %v879_v10 = vld [vmem:[#allocation2 + $0x40] ss:$8 sps:$4 sm:$0xff]   ;;  %583 = vmatprep.subr.bf16.mxu1 %v1038_v0 }
  0x2b   :  { %v880_v11 = vld [vmem:[#allocation2 + $0x54] ss:$8 sps:$4 sm:$0xff]   ;;  %v882_v12 = vld [vmem:[#allocation2 + $0x50] ss:$8 sps:$4 sm:$0xff]   ;;  %v883_v13 = vld [vmem:[#allocation2 + $0x64] ss:$8 sps:$4 sm:$0xff]  }
  0x2c   :  { %v57_v14 = vld [vmem:[%s1173_s0 + $0x8] sm:$0xff]  ;;  %v886_v17 = vld [vmem:[#allocation2 + $0x74] ss:$8 sps:$4 sm:$0xff]   ;;  %v888_v18 = vld [vmem:[#allocation2 + $0x70] ss:$8 sps:$4 sm:$0xff]   ;;  %vm376_vm0 = vcmask 130048  }
  0x2d   :  { %383 = vmatpush1.bf16.msra.mxu0 %v870_v4  ;;  %v61_v15 = vpack.c.bf16 %v57_v14, %v57_v14  ;;  %v885_v16 = vld [vmem:[#allocation2 + $0x60] ss:$8 sps:$4 sm:$0xff]   ;;  %v889_v19 = vld [vmem:[#allocation2 + $0x84] ss:$8 sps:$4 sm:$0xff]   ;;  %v892_v21 = vld [vmem:[#allocation2 + $0x94] ss:$8 sps:$4 sm:$0xff]  }
  0x2e   :  { %384 = vmatprep.subr.bf16.mxu0 %v871_v5  ;;  %v891_v20 = vld [vmem:[#allocation2 + $0x80] ss:$8 sps:$4 sm:$0xff]   ;;  %v894_v22 = vld [vmem:[#allocation2 + $0x90] ss:$8 sps:$4 sm:$0xff]   ;;  %v895_v24 = vld [vmem:[#allocation2 + $0xa4] ss:$8 sps:$4 sm:$0xff]  }
  0x2f   :  { %412 = vmatprep.mubr.bf16.mxu0 %v61_v15  ;;  %v941_v25 = vld [vmem:[#allocation5 + $0x8] sm:$0xff]   ;;  %v897_v26 = vld [vmem:[#allocation2 + $0xa0] ss:$8 sps:$4 sm:$0xff]   ;;  %v901_v30 = vld [vmem:[#allocation2 + $0xc4] ss:$8 sps:$4 sm:$0xff]   ;;  %vm577_vm1 = vcmask 1043456  }
  0x30   :  { %v898_v27 = vld [vmem:[#allocation2 + $0xb4] ss:$8 sps:$4 sm:$0xff]   ;;  %584 = vmatpush1.bf16.msra.mxu1 %v941_v25  ;;  %v942_v28 = vld [vmem:[#allocation5 + $0x10] sm:$0xff]   ;;  %v900_v29 = vld [vmem:[#allocation2 + $0xb0] ss:$8 sps:$4 sm:$0xff]   ;;  %vm573_vm2 = vcmask 588800  }
  0x31   :  { %385 = vmatpush1.bf16.msra.mxu0 %v873_v6  ;;  %585 = vmatprep.subr.bf16.mxu1 %v1038_v0  ;;  %v903_v31 = vld [vmem:[#allocation2 + $0xc0] ss:$8 sps:$4 sm:$0xff]   ;;  %v904_v33 = vld [vmem:[#allocation2 + $0xd4] ss:$8 sps:$4 sm:$0xff]   ;;  %v906_v35 = vld [vmem:[#allocation2 + $0xd0] ss:$8 sps:$4 sm:$0xff]  }
  0x32   :  { %386 = vmatprep.subr.bf16.mxu0 %v874_v7  ;;  %v943_v32 = vld [vmem:[#allocation5 + $0x18] sm:$0xff]   ;;  %v944_v34 = vld [vmem:[#allocation5 + $0x20] sm:$0xff]   ;;  %v945_v37 = vld [vmem:[#allocation5 + $0x28] sm:$0xff]   ;;  %vm686_vm3 = vcmask 1041408   ;;  %vm1040_vm4 = vmmov 0   ;;  %vm682_vm5 = vcmask 818176  }
  0x33   :  { %v907_v36 = vld [vmem:[#allocation2 + $0xe4] ss:$8 sps:$4 sm:$0xff]   ;;  %v909_v38 = vld [vmem:[#allocation2 + $0xe0] ss:$8 sps:$4 sm:$0xff]   ;;  %v910_v39 = vld [vmem:[#allocation2 + $0xf4] ss:$8 sps:$4 sm:$0xff]  }
  0x34   :  { %586 = vmatpush1.bf16.msra.mxu1 %v942_v28  ;;  %v946_v40 = vld [vmem:[#allocation5 + $0x30] sm:$0xff]   ;;  %v912_v41 = vld [vmem:[#allocation2 + $0xf0] ss:$8 sps:$4 sm:$0xff]   ;;  %v947_v45 = vld [vmem:[#allocation5 + $0x38] sm:$0xff]   ;;  %s1041_s3 = smov [#allocation7]   ;;  %vm730_vm6 = vcmask 80896  }
  0x35   :  { %387 = vmatpush1.bf16.msra.mxu0 %v876_v8  ;;  %587 = vmatprep.subr.bf16.mxu1 %v1038_v0  ;;  %v56_v42 = vld [vmem:[%s1173_s0] sm:$0xff]  ;;  %v59_v44 = vld [vmem:[%s1173_s0 + $0x18] sm:$0xff]  ;;  %v948_v50 = vld [vmem:[#allocation5 + $0x40] sm:$0xff]   ;;  %s738_s28 = sshll.u32 %s1041_s3, 4  ;;  %s739_s28 = int_to_ptr.vmem [resolvable:$true] %s738_s28 }
  0x36   :  { %388 = vmatprep.subr.bf16.mxu0 %v877_v9  ;;  %v915_v43 = vld [vmem:[#allocation2 + $0x104] ss:$8 sps:$4 sm:$0xff]   ;;  %v60_v46 = vpack.c.bf16 %v56_v42, %v56_v42  ;;  %v913_v47 = vld [vmem:[#allocation2 + $0x100] ss:$8 sps:$4 sm:$0xff]   ;;  %v63_v48 = vpack.c.bf16 %v59_v44, %v59_v44  ;;  %v918_v49 = vld [vmem:[#allocation2 + $0x114] ss:$8 sps:$4 sm:$0xff]   ;;  %p1009_p3 = scmp.lt.s32.totalorder %s739_s28, %s739_s28 }
  0x37   :  { %v916_v51 = vld [vmem:[#allocation2 + $0x110] ss:$8 sps:$4 sm:$0xff]   ;;  %v921_v52 = vld [vmem:[#allocation2 + $0x124] ss:$8 sps:$4 sm:$0xff]   ;;  %v919_v54 = vld [vmem:[#allocation2 + $0x120] ss:$8 sps:$4 sm:$0xff]  }
  0x38   :  { %588 = vmatpush1.bf16.msra.mxu1 %v943_v32  ;;  %v949_v53 = vld [vmem:[#allocation5 + $0x48] sm:$0xff]   ;;  %v950_v56 = vld [vmem:[#allocation5 + $0x50] sm:$0xff]   ;;  %v58_v5 = vld [vmem:[%s1173_s0 + $0x10] sm:$0xff] }
  0x39   :  { %389 = vmatpush1.bf16.msra.mxu0 %v879_v10  ;;  %589 = vmatprep.subr.bf16.mxu1 %v1038_v0  ;;  %v924_v55 = vld [vmem:[#allocation2 + $0x134] ss:$8 sps:$4 sm:$0xff]   ;;  %v922_v57 = vld [vmem:[#allocation2 + $0x130] ss:$8 sps:$4 sm:$0xff]   ;;  %v927_v58 = vld [vmem:[#allocation2 + $0x144] ss:$8 sps:$4 sm:$0xff]   ;;  %v62_v6 = vpack.c.bf16 %v58_v5, %v58_v5 }
  0x3a   :  { %390 = vmatprep.subr.bf16.mxu0 %v880_v11  ;;  %v925_v59 = vld [vmem:[#allocation2 + $0x140] ss:$8 sps:$4 sm:$0xff]   ;;  %v930_v60 = vld [vmem:[#allocation2 + $0x154] ss:$8 sps:$4 sm:$0xff]   ;;  %v928_v61 = vld [vmem:[#allocation2 + $0x150] ss:$8 sps:$4 sm:$0xff]   ;;  %v116_v11 = vlaneseq }
  0x3b   :  { %v933_v62 = vld [vmem:[#allocation2 + $0x164] ss:$8 sps:$4 sm:$0xff]   ;;  %v931_v63 = vld [vmem:[#allocation2 + $0x160] ss:$8 sps:$4 sm:$0xff]   ;;  %v936_v1 = vld [vmem:[#allocation2 + $0x174] ss:$8 sps:$4 sm:$0xff]  }
  0x3c   :  { %590 = vmatpush1.bf16.msra.mxu1 %v944_v34  ;;  %v934_v2 = vld [vmem:[#allocation2 + $0x170] ss:$8 sps:$4 sm:$0xff]   ;;  %v939_v3 = vld [vmem:[#allocation2 + $0x184] ss:$8 sps:$4 sm:$0xff]   ;;  %v937_v4 = vld [vmem:[#allocation2 + $0x180] ss:$8 sps:$4 sm:$0xff]  }
  0x3d   :  { %391 = vmatpush1.bf16.msra.mxu0 %v882_v12  ;;  %591 = vmatprep.subr.bf16.mxu1 %v1038_v0  ;;  %v951_v7 = vld [vmem:[#allocation5 + $0x58] sm:$0xff]   ;;  %v952_v8 = vld [vmem:[#allocation5 + $0x60] ss:$0 sps:$4 sm:$0xff]   ;;  %v1039_v10 = vmov 0.0   ;;  %v117_v12 = vshrl.u32 %v116_v11, 7 }
  0x3e   :  { %392 = vmatprep.subr.bf16.mxu0 %v883_v13  ;;  %v579_v9 = vsel %vm577_vm1, %v952_v8, 0  ;;  %v114_v14 = vld [vmem:[%s1175_s2] sm:$0x3]  ;;  %v954_v28 = vld [vmem:[%s1178_s5 + $0x8] sm:$0xff]  }
  0x3f   :  { %v118_v13 = vsub.s32 0, %v117_v12  ;;  %v122_v15 = vsub.s32 1, %v117_v12  ;;  %v958_v32 = vld [vmem:[%s1178_s5 + $0x28] sm:$0xff]  }
  0x40   :  { %592 = vmatpush1.bf16.msra.mxu1 %v945_v37 }
  0x41   :  { %393 = vmatpush1.bf16.msra.mxu0 %v885_v16  ;;  %593 = vmatprep.subr.bf16.mxu1 %v1038_v0  ;;  %v119_v16 = vrot.slane %v114_v14, %v118_v13 }
  0x42   :  { %394 = vmatprep.subr.bf16.mxu0 %v886_v17  ;;  %v123_v17 = vrot.slane %v114_v14, %v122_v15 }
  0x44   :  { %594 = vmatpush1.bf16.msra.mxu1 %v946_v40 }
  0x45   :  { %395 = vmatpush1.bf16.msra.mxu0 %v888_v18  ;;  %595 = vmatprep.subr.bf16.mxu1 %v1038_v0 }
  0x46   :  { %396 = vmatprep.subr.bf16.mxu0 %v889_v19 }
  0x48   :  { %596 = vmatpush1.bf16.msra.mxu1 %v947_v45 }
  0x49   :  { %397 = vmatpush1.bf16.msra.mxu0 %v891_v20  ;;  %597 = vmatprep.subr.bf16.mxu1 %v1038_v0 }
  0x4a   :  { %398 = vmatprep.subr.bf16.mxu0 %v892_v21 }
  0x4c   :  { %598 = vmatpush1.bf16.msra.mxu1 %v948_v50 }
  0x4d   :  { %399 = vmatpush1.bf16.msra.mxu0 %v894_v22  ;;  %599 = vmatprep.subr.bf16.mxu1 %v1038_v0 }
  0x4e   :  { %400 = vmatprep.subr.bf16.mxu0 %v895_v24 }
  0x50   :  { %600 = vmatpush1.bf16.msra.mxu1 %v949_v53 }
  0x51   :  { %401 = vmatpush1.bf16.msra.mxu0 %v897_v26  ;;  %601 = vmatprep.subr.bf16.mxu1 %v1038_v0  ;;  %v953_v26 = vld [vmem:[%s1178_s5] sm:$0xff]  }
  0x52   :  { %402 = vmatprep.subr.bf16.mxu0 %v898_v27 }
  0x54   :  { %602 = vmatpush1.bf16.msra.mxu1 %v950_v56 }
  0x55   :  { %403 = vmatpush1.bf16.msra.mxu0 %v900_v29  ;;  %603 = vmatprep.subr.bf16.mxu1 %v1038_v0  ;;  %v955_v29 = vld [vmem:[%s1178_s5 + $0x10] sm:$0xff]  }
  0x56   :  { %404 = vmatprep.subr.bf16.mxu0 %v901_v30  ;;  %v956_v30 = vld [vmem:[%s1178_s5 + $0x18] sm:$0xff]  }
  0x58   :  { %604 = vmatpush1.bf16.msra.mxu1 %v951_v7 }
  0x59   :  { %405 = vmatpush1.bf16.msra.mxu0 %v903_v31  ;;  %605 = vmatprep.subr.bf16.mxu1 %v1038_v0  ;;  %v957_v31 = vld [vmem:[%s1178_s5 + $0x20] sm:$0xff]  }
  0x5a   :  { %406 = vmatprep.subr.bf16.mxu0 %v904_v33  ;;  %v959_v33 = vld [vmem:[%s1178_s5 + $0x30] ss:$0 sps:$4 sm:$0x33]  }
  0x5b   :  { %v688_v34 = vsel %vm686_vm3, %v959_v33, 0 }
  0x5c   :  { %606 = vmatpush1.bf16.msra.mxu1 %v579_v9 }
  0x5d   :  { %407 = vmatpush1.bf16.msra.mxu0 %v906_v35  ;;  %831 = vmatprep.subr.bf16.mxu1 %v1039_v10  ;;  %v799_v35 = vld [vmem:[%s1177_s4] ss:$0 sm:$0xff]  ;;  %s1004_s4 = scalar_lea.vmem %s739_s28, 128 }
  0x5e   :  { %408 = vmatprep.subr.bf16.mxu0 %v907_v36  ;;  %p1005_p2 = scmp.ne.s32.totalorder %s739_s28, %s1004_s4  ;;  %p1010_p4 = scmp.lt.s32.totalorder %s1004_s4, %s1004_s4 }
  0x60   :  { %p1011_p5 = por %p1010_p4, %p1009_p3 }
  0x61   :  { %409 = vmatpush1.bf16.msra.mxu0 %v909_v38 }
  0x62   :  { %410 = vmatprep.subr.bf16.mxu0 %v910_v39  ;;  %p1012_p6 = pnand %p1011_p5, %p1005_p2 }
  0x65   :  { %411 = vmatpush1.bf16.msra.mxu0 %v912_v41 }
  0x66   :  { %421 = vmatprep.subr.bf16.mxu0 %v915_v43  ;;  %v814_v43 = vld [vmem:[%s1179_s6] ss:$0 sm:$0xff] }
  0x68   :  { %413 = vmatmul.mubr.bf16.vlgmr.msra.gmra.mrb[0].mxu0 %v60_v46 }
  0x69   :  { %422 = vmatpush1.bf16.msra.mxu0 %v913_v47  ;;  %798 = vmatprep.mubr.msk.bf16.mxu0 %vm376_vm0, %v63_v48 }
  0x6a   :  { %423 = vmatprep.subr.bf16.mxu0 %v918_v49 }
  0x6d   :  { %424 = vmatpush1.bf16.msra.mxu0 %v916_v51 }
  0x6e   :  { %425 = vmatprep.subr.bf16.mxu0 %v921_v52 }
  0x71   :  { %426 = vmatpush1.bf16.msra.mxu0 %v919_v54 }
  0x72   :  { %427 = vmatprep.subr.bf16.mxu0 %v924_v55 }
  0x75   :  { %428 = vmatpush1.bf16.msra.mxu0 %v922_v57 }
  0x76   :  { %429 = vmatprep.subr.bf16.mxu0 %v927_v58 }
  0x79   :  { %430 = vmatpush1.bf16.msra.mxu0 %v925_v59 }
  0x7a   :  { %431 = vmatprep.subr.bf16.mxu0 %v930_v60 }
  0x7d   :  { %432 = vmatpush1.bf16.msra.mxu0 %v928_v61 }
  0x7e   :  { %433 = vmatprep.subr.bf16.mxu0 %v933_v62 }
  0x81   :  { %434 = vmatpush1.bf16.msra.mxu0 %v931_v63 }
  0x82   :  { %435 = vmatprep.subr.bf16.mxu0 %v936_v1 }
  0x85   :  { %436 = vmatpush1.bf16.msra.mxu0 %v934_v2 }
  0x86   :  { %437 = vmatprep.subr.bf16.mxu0 %v939_v3 }
  0x89   :  { %438 = vmatpush1.bf16.msra.mxu0 %v937_v4 }
  0x8c   :  { %454 = vmatmul.mubr.bf16.vlgmr.msra.gmra.mrb[0].mxu0 %v62_v6 }
 0x15f   :  { %v455_v18 = vpop.f32.mrb[0].mxu0 }
 0x160   :  { %v849_v19 = vadd.f32 %v455_v18, %v119_v16  ;;  %v457_v20 = vpop.f32.mrb[1].mxu0 }
 0x161   :  { %v850_v0 = vadd.f32 %v457_v20, %v123_v17  ;;  %v459_v21 = vpop.f32.mrb[2].mxu0 }
 0x162   :  { %v462_v22 = vmax.f32 %v849_v19, 0.0  ;;  %v460_v23 = vpop.f32.mrb[3].mxu0 }
 0x163   :  { %v463_v24 = vmax.f32 %v850_v0, 0.0 }
 0x164   :  { %v464_v27 = vpack.c.bf16 %v462_v22, %v462_v22 }
 0x165   :  { %v465_v25 = vpack.c.bf16 %v463_v24, %v463_v24 }
 0x167   :  { %813 = vmatprep.mubr.msk.bf16.mxu1 %vm573_vm2, %v465_v25 }
 0x168   :  { %614 = vmatmul.mubr.bf16.vlgmr.msra.gmra.mrb[0].mxu1 %v464_v27 }
 0x169   :  { %832 = vmatpush3.bf16.msra.mxu1 %v953_v26  ;;  %845 = vmatprep.mubr.msk.bf16.mxu1 %vm1040_vm4, %v1039_v10 }
 0x16a   :  { %833 = vmatprep.subr.bf16.mxu1 %v1039_v10 }
 0x16d   :  { %834 = vmatpush3.bf16.msra.mxu1 %v954_v28 }
 0x16e   :  { %835 = vmatprep.subr.bf16.mxu1 %v1039_v10 }
 0x171   :  { %836 = vmatpush3.bf16.msra.mxu1 %v955_v29 }
 0x172   :  { %837 = vmatprep.subr.bf16.mxu1 %v1039_v10 }
 0x175   :  { %838 = vmatpush3.bf16.msra.mxu1 %v956_v30 }
 0x176   :  { %839 = vmatprep.subr.bf16.mxu1 %v1039_v10 }
 0x179   :  { %840 = vmatpush3.bf16.msra.mxu1 %v957_v31 }
 0x17a   :  { %841 = vmatprep.subr.bf16.mxu1 %v1039_v10 }
 0x17d   :  { %842 = vmatpush3.bf16.msra.mxu1 %v958_v32 }
 0x17e   :  { %843 = vmatprep.subr.bf16.mxu1 %v1039_v10 }
 0x181   :  { %844 = vmatpush3.bf16.msra.mxu1 %v688_v34 }
 0x23b   :  { %v615_v36 = vpop.f32.mrb[0].mxu1 }
 0x23c   :  { %v616_v37 = vadd.f32 %v799_v35, %v615_v36  ;;  %v617_v38 = vpop.f32.mrb[1].mxu1 }
 0x23d   :  { %v618_v39 = vpop.f32.mrb[2].mxu1 }
 0x23e   :  { %v621_v40 = vmax.f32 %v616_v37, 0.0  ;;  %v619_v41 = vpop.f32.mrb[3].mxu1 }
 0x240   :  { %v622_v42 = vpack.c.bf16 %v621_v40, %v621_v40 }
 0x242   :  { %846 = vmatmul.mubr.msk.bf16.vlgmr.msra.gmra.mrb[4].mxu1 %vm682_vm5, %v622_v42 }
 0x315   :  { %v724_v44 = vpop.f32.mrb[4].mxu1 }
 0x316   :  { %v725_v45 = vadd.f32 %v814_v43, %v724_v44  ;;  %v847_v46 = vpop.f32.mrb[5].mxu1 }
 0x317   :  { %v727_v47 = vpop.f32.mrb[6].mxu1 }
 0x318   :  { %v848_v48 = vpop.f32.mrb[7].mxu1  ;;  %731 = vst.msk [vmem:[#allocation7] sm:$0xff] %vm730_vm6, %v725_v45 }
 0x319   :  { %1015 = shalt.err (!%p1012_p6)
}
 0x31a   :  { %s1016_s6 = scalar_lea.hbm %s1180_s7, 128 }
 0x31b   :  { %p1017_p7 = scmp.ne.s32.totalorder %s1180_s7, %s1016_s6  ;;  %p1020_p8 = scmp.lt.u32.totalorder %s1016_s6, %s1180_s7 }
 0x31d   :  { %p1022_p9 = pnand %p1020_p8, %p1017_p7 }
 0x31f   :  { %1025 = shalt.err (!%p1022_p9)
}
 0x320   :  { %741 = dma.vmem_to_hbm [thread:$0]  %s739_s28, 128, %s1180_s7, [#allocation4]  }
 0x321   :  { %1030 = dma.done.wait [#allocation4], 128  }
 0x322   :  { %1031 = vsyncadd [#allocation4], 4294967168 }
 0x323   :  { %745 = vsyncpa [#allocation3], 1 }
 0x324   :  { %746 = vsyncpa [#allocation6], 1 }
 0x325   :  { %747 = vsyncpa [#allocation4], 1 }

</bundles_post_ra>
